<compile_context>
chip_gen: v6e
topology: v6e:2x2x1
jax: 0.10.0
libtpu: 0.0.40
codegen_flags: <defaults>
</compile_context>

<pallas_src>
import jax
import jax.numpy as jnp
from jax import lax
from jax.experimental import pallas as pl
from jax.experimental.pallas import tpu as pltpu


# ------------------------------- kernels -----------------------------------

def _rowmajor_kernel(x_ref, w_ref, b_ref, o_ref, acc_ref):
    # x_ref: (tm, tk)  w_ref: (tk, tn)  b_ref: (1, tn)  o_ref: (tm, tn)
    # Grid = (H-blocks, row-blocks, K-blocks); K (featdim) is innermost.
    k = pl.program_id(2)

    @pl.when(k == 0)
    def _():
        acc_ref[...] = jnp.zeros_like(acc_ref)

    acc_ref[...] += jnp.dot(x_ref[...], w_ref[...],
                            preferred_element_type=jnp.float32)

    @pl.when(k == pl.num_programs(2) - 1)
    def _():
        o_ref[...] = jnp.maximum(acc_ref[...] + b_ref[...], 0.0).astype(o_ref.dtype)


def _chanmajor_kernel(x_ref, w_ref, b_ref, o_ref, acc_ref):
    # x_ref: (tk, tt)  w_ref: (tk, tn)  b_ref: (1, tn)  o_ref: (tt, tn)
    # Grid = (H-blocks, B, T-blocks, K-blocks); K innermost.
    k = pl.program_id(3)

    @pl.when(k == 0)
    def _():
        acc_ref[...] = jnp.zeros_like(acc_ref)

    # Contract the channel (featdim) axis directly so the (B, F, T) layout is
    # consumed as-is -- no wrapper transpose / extra HBM pass over activations.
    acc_ref[...] += lax.dot_general(
        x_ref[...], w_ref[...],
        dimension_numbers=(((0,), (0,)), ((), ())),
        preferred_element_type=jnp.float32)

    @pl.when(k == pl.num_programs(3) - 1)
    def _():
        o_ref[...] = jnp.maximum(acc_ref[...] + b_ref[...], 0.0).astype(o_ref.dtype)


# ------------------------------ planning ------------------------------------

def _round_up(x, m):
    return ((x + m - 1) // m) * m


def _vmem_budget():
    """Generation-aware VMEM budget (bytes) for block planning + vmem_limit."""
    cap = 64 * 1024 * 1024
    try:
        cap = int(pltpu.get_tpu_info().vmem_capacity_bytes)
    except Exception:
        pass
    if cap >= 120 * 1024 * 1024:          # v5e / v6e class (128 MiB physical)
        return 100 * 1024 * 1024
    return max(32 * 1024 * 1024, cap - 12 * 1024 * 1024)   # v7x class (64 MiB)


def _row_candidates(n):
    """Row-tile candidates for a token-major (rows, F) slab (mult of 8 or full)."""
    cands = []
    if n <= 1024:
        cands.append(n)                    # full-dim block, any n
    for c in (1024, 512, 256, 128, 64, 32, 16, 8):
        if c <= n and c not in cands:
            cands.append(c)
    return cands or [n]


def _time_candidates(t):
    """Time-tile candidates for a channel-major (F, T) slab (mult of 128 or full)."""
    cands = []
    if t <= 1024:
        cands.append(t)
    for c in (1024, 512, 256, 128):
        if c <= t and c not in cands:
            cands.append(c)
    return cands or [t]


def _plan_tiles(row_cands, rows, batch, F, Hp, out_cols, bx, bw, bo, budget):
    """Pick (t_rows, tn, tk) minimizing modeled HBM traffic under the VMEM budget.

    Grid order is (H-blocks outermost, row-blocks, K-blocks innermost), so:
      * weight is read once if nK == 1, else once per row block (nM passes);
      * activations are read nH times;
      * output is written once.
    A ~0.35us/step overhead is folded in as an HBM-byte equivalent.
    """
    tk_cands = [F] + [c for c in (2048, 1024, 512, 256, 128) if c < F and F % c == 0]
    tn_cands = [Hp] + [c for c in (2048, 1024, 512, 256, 128) if c < Hp and Hp % c == 0]

    x_total = batch * rows * F * bx
    w_total = F * Hp * bw
    o_total = batch * rows * out_cols * bo
    STEP_BYTES = 400_000                       # ~0.35 us of HBM time per grid step

    best, best_cost = None, None
    fallback, fallback_need = None, None
    for tn in tn_cands:
        for tk in tk_cands:
            for tm in row_cands:
                # Double-buffered x / w / out + f32 accumulator + bias.
                need = (2 * tm * tk * bx + 2 * tk * tn * bw + 2 * tm * tn * bo
                        + tm * tn * 4 + 2 * tn * 4)
                if fallback_need is None or need < fallback_need:
                    fallback, fallback_need = (tm, tn, tk), need
                if need > budget:
                    continue
                nM = batch * (-(-rows // tm))
                nH = Hp // tn
                nK = F // tk
                w_passes = 1 if nK == 1 else nM
                cost = (nH * x_total + w_passes * w_total + o_total
                        + nH * nM * nK * STEP_BYTES)
                if best_cost is None or cost < best_cost:
                    best, best_cost = (tm, tn, tk), cost
    return best if best is not None else fallback


# ------------------------------- wrapper ------------------------------------

def intermediate_layer(x, weight, bias, featdim):
    """Conv1d(k=1, featdim -> H) + ReLU, returning (B, T, H) in x's dtype.

    x: (B, featdim, T) or (B, T, featdim); weight: (H, featdim); bias: (H,).
    Matches IntermediateLayer.forward (same layout heuristic as PyTorch --
    ambiguous only when T == featdim, exactly as in the original module).
    """
    H, F = weight.shape
    assert F == featdim, "weight in_channels must equal featdim"

    # Compute / I-O dtype = activation dtype (no wrapper up-cast of x).
    cd = x.dtype if jnp.issubdtype(x.dtype, jnp.floating) else jnp.float32
    if x.dtype != cd:
        x = x.astype(cd)
    bx = bw = bo = jnp.dtype(cd).itemsize

    # Lane-dense weight/bias columns: pad H to a multiple of 128 (zeros).
    # Output is written at exact H when H % 128 == 0 (no pad, no slice);
    # otherwise keep the known-good pad + post-slice path.
    Hp = max(128, _round_up(H, 128))
    pad_out = (Hp != H)
    out_cols = Hp if pad_out else H

    w_fh = jnp.transpose(weight, (1, 0)).astype(cd)          # (F, H), tiny cast
    b_vec = bias.astype(jnp.float32)
    if pad_out:
        w_fh = jnp.pad(w_fh, ((0, 0), (0, Hp - H)))
        b_vec = jnp.pad(b_vec, (0, Hp - H))
    b_1h = b_vec.reshape(1, Hp)

    budget = _vmem_budget()

    chan_major = (x.shape[1] == featdim)                      # PyTorch heuristic
    if chan_major and x.shape[2] < 128:
        # Short sequences: lane-masked loads + B*(T/tt) tiny grid steps make the
        # channel-major path step-overhead bound; one wrapper transpose to the
        # token-major slab is cheaper.
        x = jnp.transpose(x, (0, 2, 1))                       # (B, T, F)
        chan_major = False

    if not chan_major:
        # Token-major (B, T, F): flatten to an (M, F) slab (free reshape).
        B, T = x.shape[0], x.shape[1]
        M = B * T
        x2d = x.reshape(M, F)                                 # native dtype
        tm, tn, tk = _plan_tiles(_row_candidates(M), M, 1, F, Hp, out_cols,
                                 bx, bw, bo, budget)
        nH, nM, nK = Hp // tn, pl.cdiv(M, tm), F // tk
        cost = pl.CostEstimate(
            flops=2 * M * F * Hp, transcendentals=0,
            bytes_accessed=(nH * M * F * bx
                            + (1 if nK == 1 else nM) * F * Hp * bw
                            + M * out_cols * bo))
        out2d = pl.pallas_call(
            _rowmajor_kernel,
            out_shape=jax.ShapeDtypeStruct((M, out_cols), cd),
            grid_spec=pltpu.PrefetchScalarGridSpec(
                num_scalar_prefetch=0,
                grid=(nH, nM, nK),
                in_specs=[
                    pl.BlockSpec((tm, tk), lambda j, i, k: (i, k)),
                    pl.BlockSpec((tk, tn), lambda j, i, k: (k, j)),
                    pl.BlockSpec((1, tn), lambda j, i, k: (0, j)),
                ],
                out_specs=pl.BlockSpec((tm, tn), lambda j, i, k: (i, j)),
                scratch_shapes=[pltpu.VMEM((tm, tn), jnp.float32)],
            ),
            compiler_params=pltpu.CompilerParams(
                dimension_semantics=("parallel", "parallel", "arbitrary"),
                vmem_limit_bytes=int(budget)),
            cost_estimate=cost,
        )(x2d, w_fh, b_1h)
        out = (out2d[:, :H] if pad_out else out2d).reshape(B, T, H)
    else:
        # Channel-major (B, F, T), T >= 128: consume layout directly in-kernel.
        B, _, T = x.shape
        tt, tn, tk = _plan_tiles(_time_candidates(T), T, B, F, Hp, out_cols,
                                 bx, bw, bo, budget)
        nH, nT, nK = Hp // tn, pl.cdiv(T, tt), F // tk
        cost = pl.CostEstimate(
            flops=2 * B * T * F * Hp, transcendentals=0,
            bytes_accessed=(nH * B * T * F * bx
                            + (1 if nK == 1 else B * nT) * F * Hp * bw
                            + B * T * out_cols * bo))
        out3d = pl.pallas_call(
            _chanmajor_kernel,
            out_shape=jax.ShapeDtypeStruct((B, T, out_cols), cd),
            grid_spec=pltpu.PrefetchScalarGridSpec(
                num_scalar_prefetch=0,
                grid=(nH, B, nT, nK),
                in_specs=[
                    pl.BlockSpec((None, tk, tt), lambda j, b, t, k: (b, k, t)),
                    pl.BlockSpec((tk, tn), lambda j, b, t, k: (k, j)),
                    pl.BlockSpec((1, tn), lambda j, b, t, k: (0, j)),
                ],
                out_specs=pl.BlockSpec((None, tt, tn), lambda j, b, t, k: (b, t, j)),
                scratch_shapes=[pltpu.VMEM((tt, tn), jnp.float32)],
            ),
            compiler_params=pltpu.CompilerParams(
                dimension_semantics=("parallel", "parallel", "parallel", "arbitrary"),
                vmem_limit_bytes=int(budget)),
            cost_estimate=cost,
        )(x, w_fh, b_1h)
        out = out3d[..., :H] if pad_out else out3d

    return out


# ------------------------------ reference -----------------------------------

def _reference(x, weight, bias, featdim):
    # Pure-JAX reference mirroring the PyTorch module.
    if x.shape[1] != featdim:
        x = jnp.transpose(x, (0, 2, 1))              # -> (B, F, T)
    y = jnp.einsum("bft,hf->bht", x, weight) + bias[None, :, None]
    return jax.nn.relu(jnp.transpose(y, (0, 2, 1)))  # (B, T, H)


if __name__ == "__main__":
    B, F, T, H = 2, 32, 16, 64   # batch, featdim, time, hidden_size

    key = jax.random.PRNGKey(0)
    kx, kw, kb, kx2 = jax.random.split(key, 4)

    # Conv1d weight is (H, F, 1) in PyTorch -> (H, F) here.
    weight = jax.random.normal(kw, (H, F), dtype=jnp.float32) * 0.1
    bias = jax.random.normal(kb, (H,), dtype=jnp.float32) * 0.1

    # (B, featdim, T) input with short T -> token-major fallback path.
    x = jax.random.normal(kx, (B, F, T), dtype=jnp.float32)
    ref = _reference(x, weight, bias, featdim=F)
    out = jax.block_until_ready(intermediate_layer(x, weight, bias, featdim=F))
    assert out.shape == (B, T, H)
    assert jnp.allclose(out, ref, atol=1e-5, rtol=1e-5)

    # (B, T, featdim) input -> the transpose branch of forward().
    x_btf = jnp.transpose(x, (0, 2, 1))
    out2 = jax.block_until_ready(intermediate_layer(x_btf, weight, bias, featdim=F))
    assert out2.shape == (B, T, H)
    assert jnp.allclose(out2, ref, atol=1e-5, rtol=1e-5)

    # (B, featdim, T) with T >= 128 -> channel-major in-kernel contraction path.
    T2 = 128
    x_long = jax.random.normal(kx2, (B, F, T2), dtype=jnp.float32)
    ref_long = _reference(x_long, weight, bias, featdim=F)
    out3 = jax.block_until_ready(intermediate_layer(x_long, weight, bias, featdim=F))
    assert out3.shape == (B, T2, H)
    assert jnp.allclose(out3, ref_long, atol=1e-5, rtol=1e-5)

    # bf16 activations: native-dtype I/O path (no wrapper up-cast), bf16 output.
    x_bf16 = x_long.astype(jnp.bfloat16)
    out4 = jax.block_until_ready(intermediate_layer(x_bf16, weight, bias, featdim=F))
    assert out4.shape == (B, T2, H) and out4.dtype == jnp.bfloat16
    ref_bf16 = _reference(x_bf16.astype(jnp.float32), weight, bias, featdim=F)
    assert jnp.allclose(out4.astype(jnp.float32), ref_bf16, atol=5e-2, rtol=5e-2)

    print("KERNEL_OK")
</pallas_src>

<mosaic_0001>
module attributes {stable_mosaic.version = 11 : i64} {
  func.func @_rowmajor_kernel(%arg0: i32, %arg1: i32, %arg2: i32, %arg3: memref<32x32xf32, #tpu.memory_space<vmem>>, %arg4: memref<32x128xf32, #tpu.memory_space<vmem>>, %arg5: memref<1x128xf32, #tpu.memory_space<vmem>>, %arg6: memref<32x128xf32, #tpu.memory_space<vmem>>, %arg7: memref<32x128xf32, #tpu.memory_space<vmem>>) attributes {dimension_semantics = [#tpu.dimension_semantics<parallel>, #tpu.dimension_semantics<parallel>, #tpu.dimension_semantics<arbitrary>], iteration_bounds = array<i64: 1, 1, 1>, scalar_prefetch = 0 : i64, scratch_operands = 1 : i64, tpu.core_type = #tpu.core_type<tc>, window_params = [{transform_indices = @transform_0, window_bounds = array<i64: 32, 32>}, {transform_indices = @transform_1, window_bounds = array<i64: 32, 128>}, {transform_indices = @transform_2, window_bounds = array<i64: 1, 128>}, {transform_indices = @transform_3, window_bounds = array<i64: 32, 128>}]} {
    %c0_i32 = arith.constant 0 : i32
    %0 = arith.cmpi eq, %arg2, %c0_i32 : i32
    %1 = arith.extui %0 : i1 to i32
    %c0_i32_0 = arith.constant 0 : i32
    %2 = arith.cmpi ne, %1, %c0_i32_0 : i32
    scf.if %2 {
      %cst_10 = arith.constant 0.000000e+00 : f32
      %12 = vector.broadcast %cst_10 : f32 to vector<32x128xf32>
      %c0_11 = arith.constant 0 : index
      %c0_12 = arith.constant 0 : index
      %13 = vector.load %arg7[%c0_11, %c0_12] : memref<32x128xf32, #tpu.memory_space<vmem>>, vector<32x128xf32>
      tpu.vector_store %arg7[%c0_11, %c0_12], %12 {strides = array<i32>} : memref<32x128xf32, #tpu.memory_space<vmem>>, vector<32x128xf32>,
    } else {
    }
    %c0 = arith.constant 0 : index
    %c0_1 = arith.constant 0 : index
    %3 = vector.load %arg7[%c0, %c0_1] : memref<32x128xf32, #tpu.memory_space<vmem>>, vector<32x128xf32>
    %c0_2 = arith.constant 0 : index
    %c0_3 = arith.constant 0 : index
    %4 = vector.load %arg3[%c0_2, %c0_3] : memref<32x32xf32, #tpu.memory_space<vmem>>, vector<32x32xf32>
    %c0_4 = arith.constant 0 : index
    %c0_5 = arith.constant 0 : index
    %5 = vector.load %arg4[%c0_4, %c0_5] : memref<32x128xf32, #tpu.memory_space<vmem>>, vector<32x128xf32>
    %cst = arith.constant dense<0.000000e+00> : vector<32x128xf32>
    %6 = tpu.matmul %4, %5, %cst {dimension_numbers = #tpu.dot_dimension_numbers<[1], [0], [0], [1], [0, 0, 1, 1], [], []>} : vector<32x32xf32>, vector<32x128xf32>, vector<32x128xf32> -> vector<32x128xf32>
    %7 = arith.addf %3, %6 : vector<32x128xf32>
    %c0_6 = arith.constant 0 : index
    %c0_7 = arith.constant 0 : index
    %8 = vector.load %arg7[%c0_6, %c0_7] : memref<32x128xf32, #tpu.memory_space<vmem>>, vector<32x128xf32>
    tpu.vector_store %arg7[%c0_6, %c0_7], %7 {strides = array<i32>} : memref<32x128xf32, #tpu.memory_space<vmem>>, vector<32x128xf32>,
    %c0_i32_8 = arith.constant 0 : i32
    %9 = arith.cmpi eq, %arg2, %c0_i32_8 : i32
    %10 = arith.extui %9 : i1 to i32
    %c0_i32_9 = arith.constant 0 : i32
    %11 = arith.cmpi ne, %10, %c0_i32_9 : i32
    scf.if %11 {
      %c0_10 = arith.constant 0 : index
      %c0_11 = arith.constant 0 : index
      %12 = vector.load %arg7[%c0_10, %c0_11] : memref<32x128xf32, #tpu.memory_space<vmem>>, vector<32x128xf32>
      %c0_12 = arith.constant 0 : index
      %c0_13 = arith.constant 0 : index
      %13 = vector.load %arg5[%c0_12, %c0_13] : memref<1x128xf32, #tpu.memory_space<vmem>>, vector<1x128xf32>
      %14 = vector.broadcast %13 : vector<1x128xf32> to vector<32x128xf32>
      %15 = arith.addf %12, %14 : vector<32x128xf32>
      %cst_14 = arith.constant 0.000000e+00 : f32
      %16 = vector.broadcast %cst_14 : f32 to vector<32x128xf32>
      %17 = arith.maximumf %15, %16 : vector<32x128xf32>
      %c0_15 = arith.constant 0 : index
      %c0_16 = arith.constant 0 : index
      %18 = vector.load %arg6[%c0_15, %c0_16] : memref<32x128xf32, #tpu.memory_space<vmem>>, vector<32x128xf32>
      tpu.vector_store %arg6[%c0_15, %c0_16], %17 {strides = array<i32>} : memref<32x128xf32, #tpu.memory_space<vmem>>, vector<32x128xf32>,
    } else {
    }
    return
  }
  func.func @transform_0(%arg0: i32, %arg1: i32, %arg2: i32) -> (i32, i32) {
    %c0_i32 = arith.constant 0 : i32
    return %arg1, %arg2 : i32, i32
  }
  func.func @transform_1(%arg0: i32, %arg1: i32, %arg2: i32) -> (i32, i32) {
    %c0_i32 = arith.constant 0 : i32
    return %arg2, %arg0 : i32, i32
  }
  func.func @transform_2(%arg0: i32, %arg1: i32, %arg2: i32) -> (i32, i32) {
    %c0_i32 = arith.constant 0 : i32
    %c0_i32_0 = arith.constant 0 : i32
    return %c0_i32, %arg0 : i32, i32
  }
  func.func @transform_3(%arg0: i32, %arg1: i32, %arg2: i32) -> (i32, i32) {
    %c0_i32 = arith.constant 0 : i32
    return %arg1, %arg0 : i32, i32
  }
}

</mosaic_0001>

<bundles_post_ra>
// kernel: tpu_custom_call.1
= control target key start
LH: loop header
LB: loop body
LE: loop exit
PB: predicated region body
PF: predicated region fallthrough
CT: control target
= control target key end

     0   :  { %8 = vsyncpa [#allocation4], 0  ;;  %s365_s0 = inlined_call_operand.hbm [shape: f32[32,32], index: 0, kind: input, shape index: {}]   ;;  %s366_s1 = inlined_call_operand.hbm [shape: f32[32,128], index: 1, kind: input, shape index: {}]   ;;  %s367_s2 = inlined_call_operand.vmem [shape: f32[1,128], index: 2, kind: input, shape index: {}]   ;;  %s368_s3 = inlined_call_operand.hbm [shape: f32[32,128], index: 3, kind: output, shape index: {}]  }
   0x1   :  { %9 = vsyncpa [#allocation7], 0 }
   0x2   :  { %10 = vsyncpa [#allocation5], 0  ;;  %s319_s12 = smov [#allocation3]  }
   0x3   :  { %s16_s13 = sshll.u32 %s319_s12, 4  ;;  %s17_s13 = int_to_ptr.vmem [resolvable:$true] %s16_s13 }
   0x4   :  { %s261_s14 = scalar_lea.vmem %s17_s13, 512  ;;  %p266_p1 = scmp.lt.s32.totalorder %s17_s13, %s17_s13 }
   0x5   :  { %p262_p0 = scmp.ne.s32.totalorder %s17_s13, %s261_s14  ;;  %p267_p2 = scmp.lt.s32.totalorder %s261_s14, %s261_s14 }
   0x7   :  { %p268_p3 = por %p267_p2, %p266_p1 }
   0x9   :  { %p269_p4 = pnand %p268_p3, %p262_p0 }
   0xb   :  { %272 = shalt.err (!%p269_p4)
}
   0xc   :  { %s320_s15 = smov 128   ;;  %s321_s16 = smov 8  }
   0xd   :  { %22 = dma.hbm_to_vmem [thread:$0]  %s365_s0, 512, %s17_s13, [#allocation4], %s320_s15, %s320_s15, %s321_s16  }
   0xe   :  { %s322_s19 = smov [#allocation6]  }
   0xf   :  { %s28_s20 = sshll.u32 %s322_s19, 4  ;;  %s29_s20 = int_to_ptr.vmem [resolvable:$true] %s28_s20 }
  0x10   :  { %s281_s21 = scalar_lea.vmem %s29_s20, 512  ;;  %p286_p6 = scmp.lt.s32.totalorder %s29_s20, %s29_s20 }
  0x11   :  { %p282_p5 = scmp.ne.s32.totalorder %s29_s20, %s281_s21  ;;  %p287_p7 = scmp.lt.s32.totalorder %s281_s21, %s281_s21 }
  0x13   :  { %p288_p8 = por %p287_p7, %p286_p6 }
  0x15   :  { %p289_p9 = pnand %p288_p8, %p282_p5 }
  0x17   :  { %292 = shalt.err (!%p289_p9)
}
  0x18   :  { %34 = dma.hbm_to_vmem [thread:$0]  %s366_s1, 512, %s29_s20, [#allocation7], %s320_s15, %s320_s15, %s321_s16  }
  0x19   :  { %313 = dma.done.wait [#allocation4], 512  }
  0x1a   :  { %314 = vsyncadd [#allocation4], 4294966784 }
  0x1b   :  { %315 = dma.done.wait [#allocation7], 512  }
  0x1c   :  { %316 = vsyncadd [#allocation7], 4294966784  ;;  %v62_v0 = vld [vmem:[#allocation6 + $0x18] sm:$0xff]  ;;  %v61_v1 = vld [vmem:[#allocation6 + $0x10] sm:$0xff]  ;;  %vm63_vm0 = vcmask 261120   ;;  %s323_s24 = smov [#allocation8]  }
  0x1d   :  { %226 = vmatprep.subr.mxu0 %v62_v0  ;;  %240 = vmatprep.subr.mxu1 %v62_v0  ;;  %v60_v2 = vld [vmem:[#allocation6 + $0x8] sm:$0xff]  ;;  %v59_v3 = vld [vmem:[#allocation6] sm:$0xff]  ;;  %v57_v5 = vld [vmem:[#allocation3 + $0x10] sm:$0xff]  ;;  %s200_s25 = sshll.u32 %s323_s24, 4  ;;  %s201_s25 = int_to_ptr.vmem [resolvable:$true] %s200_s25 }
  0x1e   :  { %227 = vmatpush3.msra.mxu0 %v62_v0  ;;  %244 = vmatpush3.msra.mxu1 %v62_v0  ;;  %v55_v4 = vld [vmem:[#allocation3] sm:$0xff]  ;;  %v56_v6 = vld [vmem:[#allocation3 + $0x8] sm:$0xff]  ;;  %v58_v7 = vld [vmem:[#allocation3 + $0x18] sm:$0xff]  ;;  %p298_p11 = scmp.lt.s32.totalorder %s201_s25, %s201_s25 }
  0x1f   :  { %228 = vmatprep.subr.mxu0 %v61_v1  ;;  %241 = vmatprep.subr.mxu1 %v61_v1  ;;  %v217_v8 = vld [vmem:[%s367_s2] ss:$0 sm:$0xff]  ;;  %s293_s2 = scalar_lea.vmem %s201_s25, 512 }
  0x20   :  { %229 = vmatpush3.msra.mxu0 %v61_v1  ;;  %245 = vmatpush3.msra.mxu1 %v61_v1  ;;  %p294_p10 = scmp.ne.s32.totalorder %s201_s25, %s293_s2  ;;  %p299_p12 = scmp.lt.s32.totalorder %s293_s2, %s293_s2 }
  0x21   :  { %230 = vmatprep.subr.mxu0 %v60_v2  ;;  %242 = vmatprep.subr.mxu1 %v60_v2 }
  0x22   :  { %231 = vmatpush3.msra.mxu0 %v60_v2  ;;  %246 = vmatpush3.msra.mxu1 %v60_v2  ;;  %p300_p13 = por %p299_p12, %p298_p11 }
  0x23   :  { %232 = vmatprep.subr.mxu0 %v59_v3  ;;  %243 = vmatprep.subr.mxu1 %v59_v3 }
  0x24   :  { %233 = vmatpush3.msra.mxu0 %v59_v3  ;;  %247 = vmatpush3.msra.mxu1 %v59_v3  ;;  %p301_p0 = pnand %p300_p13, %p294_p10 }
  0x25   :  { %234 = vmatprep.mubr.msk.f32.mxu0 %vm63_vm0, %v55_v4  ;;  %237 = vmatprep.mubr.msk.f32.mxu1 %vm63_vm0, %v57_v5 }
  0x26   :  { %235 = vmatmul.mubr.msk.f32.vlgmr.msra.gmra.mxu0 %vm63_vm0, %v56_v6  ;;  %238 = vmatmul.mubr.msk.f32.vlgmr.msra.gmra.mxu1 %vm63_vm0, %v58_v7 }
  0xe6   :  { %v236_v9 = vpop.f32.mrf.mxu0  ;;  %v239_v10 = vpop.f32.mrf.mxu1 }
  0xe7   :  { %v184_v11 = vadd.f32 %v236_v9, %v217_v8  ;;  %v186_v12 = vadd.f32 %v239_v10, %v217_v8 }
  0xe8   :  { %v142_v13 = vpop.f32.mrf.mxu0  ;;  %v152_v14 = vpop.f32.mrf.mxu1 }
  0xe9   :  { %v188_v15 = vmax.f32 %v184_v11, 0.0  ;;  %v190_v16 = vmax.f32 %v186_v12, 0.0  ;;  %v183_v17 = vadd.f32 %v217_v8, %v142_v13  ;;  %v185_v18 = vadd.f32 %v217_v8, %v152_v14 }
  0xeb   :  { %192 = vst [vmem:[#allocation8 + $0x8] sm:$0xff] %v188_v15  ;;  %194 = vst [vmem:[#allocation8 + $0x18] sm:$0xff] %v190_v16  ;;  %v187_v19 = vmax.f32 %v183_v17, 0.0  ;;  %v189_v20 = vmax.f32 %v185_v18, 0.0 }
  0xed   :  { %191 = vst [vmem:[#allocation8] sm:$0xff] %v187_v19  ;;  %193 = vst [vmem:[#allocation8 + $0x10] sm:$0xff] %v189_v20 }
  0xee   :  { %304 = shalt.err (!%p301_p0)
}
  0xef   :  { %206 = dma.vmem_to_hbm [thread:$0]  %s201_s25, 512, %s368_s3, [#allocation5], %s320_s15, %s320_s15, %s321_s16  }
  0xf0   :  { %317 = dma.done.wait [#allocation5], 512  }
  0xf1   :  { %318 = vsyncadd [#allocation5], 4294966784 }
  0xf2   :  { %210 = vsyncpa [#allocation4], 1 }
  0xf3   :  { %211 = vsyncpa [#allocation7], 1 }
  0xf4   :  { %212 = vsyncpa [#allocation5], 1 }

</bundles_post_ra>
